<compile_context>
chip_gen: v5e
topology: v5e:2x2
jax: 0.10.0
libtpu: 0.0.40
codegen_flags: <defaults>
</compile_context>

<pallas_src>
import jax
import jax.numpy as jnp
from jax import lax
from jax.experimental import pallas as pl
from jax.experimental.pallas import tpu as pltpu

_LANES = 128                 # TPU vreg lane width
_SUBLANES = 8                # f32 sublane pack
_VMEM_BUDGET = 12 << 20      # fits the scoped-VMEM defaults of v5e/v6e/v7x
_MAX_BLOCK_B = 2048          # per-step batch-tile cap


def _leaky_relu(x, slope=0.2):
    return jnp.where(x > 0, x, slope * x)


def _round_up(n, m):
    return ((n + m - 1) // m) * m


def disc_kernel(x_ref, w1_ref, w2_ref, w3t_ref, b_ref, o_ref):
    """One batch tile of the 3-layer LeakyReLU MLP.

    x_ref  : (block_b, D_in) f32   -- cast to bf16 here (no wrapper pass over x)
    w1_ref : (D_in, Hp)      bf16  -- Hp  = round_up(H, 128), zero-padded
    w2_ref : (Hp, H2p)       bf16  -- H2p = round_up(2H, 128), zero-padded
    w3t_ref: (8, H2p)        bf16  -- row 0 = w3^T, rows 1..7 zero (full sublane
                                      group on the MXU, avoids M=1 matmul)
    b_ref  : (3, H2p)        f32   -- row 0 = b1, row 1 = b2, row 2 lane 0 = b3
    o_ref  : (1, block_b)    f32   -- lane-dense per-tile result
    """
    Hp = w1_ref.shape[1]
    H2p = w2_ref.shape[1]

    x_bf = x_ref[...].astype(jnp.bfloat16)

    # Layer 1: (bb, D_in) @ (D_in, Hp) -- bf16 MXU operands, f32 accumulate.
    h = jnp.dot(x_bf, w1_ref[...], preferred_element_type=jnp.float32)
    h = _leaky_relu(h + b_ref[0:1, :Hp])

    # Layer 2: (bb, Hp) @ (Hp, H2p).
    h = jnp.dot(h.astype(jnp.bfloat16), w2_ref[...],
                preferred_element_type=jnp.float32)
    h = _leaky_relu(h + b_ref[1:2, :H2p])

    # Layer 3: transposed-RHS matmul so the result comes out lane-dense:
    #   (8, H2p) . (bb, H2p)^T -> (8, bb); row 0 is the real output row.
    y = lax.dot_general(w3t_ref[...], h.astype(jnp.bfloat16),
                        dimension_numbers=(((1,), (1,)), ((), ())),
                        preferred_element_type=jnp.float32)
    o_ref[...] = _leaky_relu(y[0:1, :] + b_ref[2:3, 0:1])


def discriminator_forward(x, params):
    """x: (B, D_in) float32 flattened piano-roll. Returns (B, 1) float32."""
    B, D_in = x.shape
    w1, b1 = params["w1"], params["b1"]
    w2, b2 = params["w2"], params["b2"]
    w3, b3 = params["w3"], params["b3"]
    H, H2 = w1.shape[1], w2.shape[1]
    Hp, H2p = _round_up(H, _LANES), _round_up(H2, _LANES)

    # --- batch tile: largest 128-multiple that fits the VMEM budget ----------
    # Per-row VMEM: double-buffered f32 x tile + in-kernel bf16 copy of it +
    # f32/bf16 hidden activations (weights are small and resident).
    per_row = 2 * D_in * 4 + D_in * 2 + 6 * (Hp + H2p) + 64
    cap = max(_LANES,
              min(_MAX_BLOCK_B, (_VMEM_BUDGET // per_row) // _LANES * _LANES))
    block_b = _round_up(B, _SUBLANES) if B <= cap else cap
    grid_n = pl.cdiv(B, block_b)
    Bp = grid_n * block_b
    # Only tiny unaligned batches get padded (single block bigger than array);
    # ragged last blocks at large B are masked by Pallas -- no HBM copy of x.
    x_in = x if block_b <= B else jnp.pad(x, ((0, block_b - B), (0, 0)))

    # --- resident bf16 weights, zero-padded to 128-lane multiples ------------
    w1_p = jnp.zeros((D_in, Hp), jnp.bfloat16).at[:, :H].set(
        w1.astype(jnp.bfloat16))
    w2_p = jnp.zeros((Hp, H2p), jnp.bfloat16).at[:H, :H2].set(
        w2.astype(jnp.bfloat16))
    w3t_p = jnp.zeros((8, H2p), jnp.bfloat16).at[0, :H2].set(
        w3[:, 0].astype(jnp.bfloat16))
    bias = (jnp.zeros((3, H2p), jnp.float32)
            .at[0, :H].set(b1)
            .at[1, :H2].set(b2)
            .at[2, 0].set(b3[0]))

    # TODO(synk): for very large D_in (big piano rolls) add a K grid axis for
    # layer 1 with an f32 VMEM accumulator instead of one full-width x tile.
    out = pl.pallas_call(
        disc_kernel,
        out_shape=jax.ShapeDtypeStruct((1, Bp), jnp.float32),
        grid=(grid_n,),
        in_specs=[
            pl.BlockSpec((block_b, D_in), lambda i: (i, 0)),   # x tile (f32)
            pl.BlockSpec((D_in, Hp), lambda i: (0, 0)),        # W1 (resident)
            pl.BlockSpec((Hp, H2p), lambda i: (0, 0)),         # W2 (resident)
            pl.BlockSpec((8, H2p), lambda i: (0, 0)),          # W3^T (resident)
            pl.BlockSpec((3, H2p), lambda i: (0, 0)),          # biases
        ],
        out_specs=pl.BlockSpec((1, block_b), lambda i: (0, i)),
        compiler_params=pltpu.CompilerParams(
            dimension_semantics=("parallel",)),   # shards batch across TCs
    )(x_in, w1_p, w2_p, w3t_p, bias)

    return out[0, :B].reshape(B, 1)


def init_params(key, in_dim, hidden_dim):
    """Deterministic init mimicking nn.Linear's U(-1/sqrt(fan_in), 1/sqrt(fan_in))."""
    dims = [(in_dim, hidden_dim), (hidden_dim, 2 * hidden_dim), (2 * hidden_dim, 1)]
    params = {}
    for i, (fan_in, fan_out) in enumerate(dims, start=1):
        key, kw, kb = jax.random.split(key, 3)
        bound = 1.0 / jnp.sqrt(jnp.float32(fan_in))
        params[f"w{i}"] = jax.random.uniform(
            kw, (fan_in, fan_out), jnp.float32, -bound, bound
        )
        params[f"b{i}"] = jax.random.uniform(
            kb, (fan_out,), jnp.float32, -bound, bound
        )
    return params


def reference_forward(x, params):
    """Plain-JAX reference mirroring the kernel's bf16 matmul / f32 accumulate."""
    bf = jnp.bfloat16
    h = jnp.dot(x.astype(bf), params["w1"].astype(bf),
                preferred_element_type=jnp.float32)
    h = _leaky_relu(h + params["b1"])
    h = jnp.dot(h.astype(bf), params["w2"].astype(bf),
                preferred_element_type=jnp.float32)
    h = _leaky_relu(h + params["b2"])
    h = jnp.dot(h.astype(bf), params["w3"].astype(bf),
                preferred_element_type=jnp.float32)
    return _leaky_relu(h + params["b3"])


def reference_forward_f32(x, params):
    """Full-precision reference of the original module semantics."""
    h = _leaky_relu(x @ params["w1"] + params["b1"])
    h = _leaky_relu(h @ params["w2"] + params["b2"])
    return _leaky_relu(h @ params["w3"] + params["b3"])


if __name__ == "__main__":
    # im_chan=1, roll_size=(4, 8, 8) -> in_dim = 1*4*8*8 = 256, hidden_dim=16
    im_chan = 1
    roll_size = (4, 8, 8)
    hidden_dim = 16
    batch = 2
    in_dim = im_chan * roll_size[0] * roll_size[1] * roll_size[2]

    key = jax.random.PRNGKey(0)
    key, kx = jax.random.split(key)
    x = jax.random.normal(kx, (batch, in_dim), jnp.float32)
    params = init_params(key, in_dim, hidden_dim)

    out = discriminator_forward(x, params)
    out = jax.block_until_ready(out)

    ref_bf16 = reference_forward(x, params)
    ref_f32 = reference_forward_f32(x, params)
    assert out.shape == (batch, 1)
    # Tight vs bf16-mirrored reference; loose vs full-f32 module semantics.
    assert jnp.allclose(out, ref_bf16, atol=1e-2, rtol=1e-2)
    assert jnp.allclose(out, ref_f32, atol=5e-2, rtol=5e-2)

    print("KERNEL_OK")
</pallas_src>

<mosaic_0001>
module attributes {stable_mosaic.version = 11 : i64} {
  func.func @disc_kernel(%arg0: i32, %arg1: memref<8x256xf32, #tpu.memory_space<vmem>>, %arg2: memref<256x128xbf16, #tpu.memory_space<vmem>>, %arg3: memref<128x128xbf16, #tpu.memory_space<vmem>>, %arg4: memref<8x128xbf16, #tpu.memory_space<vmem>>, %arg5: memref<3x128xf32, #tpu.memory_space<vmem>>, %arg6: memref<1x8xf32, #tpu.memory_space<vmem>>) attributes {dimension_semantics = [#tpu.dimension_semantics<parallel>], iteration_bounds = array<i64: 1>, scalar_prefetch = 0 : i64, scratch_operands = 0 : i64, tpu.core_type = #tpu.core_type<tc>, window_params = [{transform_indices = @transform_0, window_bounds = array<i64: 8, 256>}, {pipeline_mode = #tpu.pipeline_mode<synchronous>, transform_indices = @transform_1, window_bounds = array<i64: 256, 128>}, {pipeline_mode = #tpu.pipeline_mode<synchronous>, transform_indices = @transform_2, window_bounds = array<i64: 128, 128>}, {pipeline_mode = #tpu.pipeline_mode<synchronous>, transform_indices = @transform_3, window_bounds = array<i64: 8, 128>}, {pipeline_mode = #tpu.pipeline_mode<synchronous>, transform_indices = @transform_4, window_bounds = array<i64: 3, 128>}, {transform_indices = @transform_5, window_bounds = array<i64: 1, 8>}]} {
    %c0 = arith.constant 0 : index
    %c0_0 = arith.constant 0 : index
    %0 = vector.load %arg1[%c0, %c0_0] : memref<8x256xf32, #tpu.memory_space<vmem>>, vector<8x256xf32>
    %1 = arith.truncf %0 : vector<8x256xf32> to vector<8x256xbf16>
    %c0_1 = arith.constant 0 : index
    %c0_2 = arith.constant 0 : index
    %2 = vector.load %arg2[%c0_1, %c0_2] : memref<256x128xbf16, #tpu.memory_space<vmem>>, vector<256x128xbf16>
    %cst = arith.constant dense<0.000000e+00> : vector<8x128xf32>
    %3 = tpu.matmul %1, %2, %cst {dimension_numbers = #tpu.dot_dimension_numbers<[1], [0], [0], [1], [0, 0, 1, 1], [], []>} : vector<8x256xbf16>, vector<256x128xbf16>, vector<8x128xf32> -> vector<8x128xf32>
    %c0_3 = arith.constant 0 : index
    %c0_4 = arith.constant 0 : index
    %4 = vector.load %arg5[%c0_3, %c0_4] : memref<3x128xf32, #tpu.memory_space<vmem>>, vector<1x128xf32>
    %5 = vector.broadcast %4 : vector<1x128xf32> to vector<8x128xf32>
    %6 = arith.addf %3, %5 : vector<8x128xf32>
    %cst_5 = arith.constant 0.000000e+00 : f32
    %7 = vector.broadcast %cst_5 : f32 to vector<8x128xf32>
    %8 = arith.cmpf ogt, %6, %7 : vector<8x128xf32>
    %cst_6 = arith.constant 2.000000e-01 : f32
    %9 = vector.broadcast %cst_6 : f32 to vector<8x128xf32>
    %10 = arith.mulf %9, %6 : vector<8x128xf32>
    %11 = arith.select %8, %6, %10 : vector<8x128xi1>, vector<8x128xf32>
    %12 = arith.truncf %11 : vector<8x128xf32> to vector<8x128xbf16>
    %c0_7 = arith.constant 0 : index
    %c0_8 = arith.constant 0 : index
    %13 = vector.load %arg3[%c0_7, %c0_8] : memref<128x128xbf16, #tpu.memory_space<vmem>>, vector<128x128xbf16>
    %cst_9 = arith.constant dense<0.000000e+00> : vector<8x128xf32>
    %14 = tpu.matmul %12, %13, %cst_9 {dimension_numbers = #tpu.dot_dimension_numbers<[1], [0], [0], [1], [0, 0, 1, 1], [], []>} : vector<8x128xbf16>, vector<128x128xbf16>, vector<8x128xf32> -> vector<8x128xf32>
    %c1 = arith.constant 1 : index
    %c0_10 = arith.constant 0 : index
    %15 = vector.load %arg5[%c1, %c0_10] : memref<3x128xf32, #tpu.memory_space<vmem>>, vector<1x128xf32>
    %16 = vector.broadcast %15 : vector<1x128xf32> to vector<8x128xf32>
    %17 = arith.addf %14, %16 : vector<8x128xf32>
    %cst_11 = arith.constant 0.000000e+00 : f32
    %18 = vector.broadcast %cst_11 : f32 to vector<8x128xf32>
    %19 = arith.cmpf ogt, %17, %18 : vector<8x128xf32>
    %cst_12 = arith.constant 2.000000e-01 : f32
    %20 = vector.broadcast %cst_12 : f32 to vector<8x128xf32>
    %21 = arith.mulf %20, %17 : vector<8x128xf32>
    %22 = arith.select %19, %17, %21 : vector<8x128xi1>, vector<8x128xf32>
    %c0_13 = arith.constant 0 : index
    %c0_14 = arith.constant 0 : index
    %23 = vector.load %arg4[%c0_13, %c0_14] : memref<8x128xbf16, #tpu.memory_space<vmem>>, vector<8x128xbf16>
    %24 = arith.truncf %22 : vector<8x128xf32> to vector<8x128xbf16>
    %cst_15 = arith.constant dense<0.000000e+00> : vector<8x8xf32>
    %25 = tpu.matmul %23, %24, %cst_15 {dimension_numbers = #tpu.dot_dimension_numbers<[1], [1], [0], [0], [0, 0, 1, 0], [], []>} : vector<8x128xbf16>, vector<8x128xbf16>, vector<8x8xf32> -> vector<8x8xf32>
    %26 = vector.extract_strided_slice %25 {offsets = [0, 0], sizes = [1, 8], strides = [1, 1]} : vector<8x8xf32> to vector<1x8xf32>
    %c2 = arith.constant 2 : index
    %c0_16 = arith.constant 0 : index
    %27 = vector.load %arg5[%c2, %c0_16] : memref<3x128xf32, #tpu.memory_space<vmem>>, vector<1x1xf32>
    %28 = vector.broadcast %27 : vector<1x1xf32> to vector<1x8xf32>
    %29 = arith.addf %26, %28 : vector<1x8xf32>
    %cst_17 = arith.constant 0.000000e+00 : f32
    %30 = vector.broadcast %cst_17 : f32 to vector<1x8xf32>
    %31 = arith.cmpf ogt, %29, %30 : vector<1x8xf32>
    %cst_18 = arith.constant 2.000000e-01 : f32
    %32 = vector.broadcast %cst_18 : f32 to vector<1x8xf32>
    %33 = arith.mulf %32, %29 : vector<1x8xf32>
    %34 = arith.select %31, %29, %33 : vector<1x8xi1>, vector<1x8xf32>
    %c0_19 = arith.constant 0 : index
    %c0_20 = arith.constant 0 : index
    %35 = vector.load %arg6[%c0_19, %c0_20] : memref<1x8xf32, #tpu.memory_space<vmem>>, vector<1x8xf32>
    tpu.vector_store %arg6[%c0_19, %c0_20], %34 {strides = array<i32>} : memref<1x8xf32, #tpu.memory_space<vmem>>, vector<1x8xf32>,
    return
  }
  func.func @transform_0(%arg0: i32) -> (i32, i32) {
    %c0_i32 = arith.constant 0 : i32
    %c0_i32_0 = arith.constant 0 : i32
    return %arg0, %c0_i32 : i32, i32
  }
  func.func @transform_1(%arg0: i32) -> (i32, i32) {
    %c0_i32 = arith.constant 0 : i32
    %c0_i32_0 = arith.constant 0 : i32
    %c0_i32_1 = arith.constant 0 : i32
    return %c0_i32, %c0_i32_0 : i32, i32
  }
  func.func @transform_2(%arg0: i32) -> (i32, i32) {
    %c0_i32 = arith.constant 0 : i32
    %c0_i32_0 = arith.constant 0 : i32
    %c0_i32_1 = arith.constant 0 : i32
    return %c0_i32, %c0_i32_0 : i32, i32
  }
  func.func @transform_3(%arg0: i32) -> (i32, i32) {
    %c0_i32 = arith.constant 0 : i32
    %c0_i32_0 = arith.constant 0 : i32
    %c0_i32_1 = arith.constant 0 : i32
    return %c0_i32, %c0_i32_0 : i32, i32
  }
  func.func @transform_4(%arg0: i32) -> (i32, i32) {
    %c0_i32 = arith.constant 0 : i32
    %c0_i32_0 = arith.constant 0 : i32
    %c0_i32_1 = arith.constant 0 : i32
    return %c0_i32, %c0_i32_0 : i32, i32
  }
  func.func @transform_5(%arg0: i32) -> (i32, i32) {
    %c0_i32 = arith.constant 0 : i32
    %c0_i32_0 = arith.constant 0 : i32
    return %c0_i32, %arg0 : i32, i32
  }
}

</mosaic_0001>

<bundles_post_ra>
// kernel: tpu_custom_call.1
= control target key start
LH: loop header
LB: loop body
LE: loop exit
PB: predicated region body
PF: predicated region fallthrough
CT: control target
= control target key end

     0   :  { %10 = vsyncpa [#allocation3], 0  ;;  %s727_s0 = inlined_call_operand.hbm [shape: f32[8,256], index: 0, kind: input, shape index: {}]   ;;  %s728_s1 = inlined_call_operand.hbm [shape: bf16[256,128], index: 1, kind: input, shape index: {}]   ;;  %s729_s2 = inlined_call_operand.hbm [shape: bf16[128,128], index: 2, kind: input, shape index: {}]   ;;  %s730_s3 = inlined_call_operand.hbm [shape: bf16[8,128], index: 3, kind: input, shape index: {}]   ;;  %s731_s4 = inlined_call_operand.hbm [shape: f32[3,128], index: 4, kind: input, shape index: {}]   ;;  %s732_s5 = inlined_call_operand.hbm [shape: f32[1,8], index: 5, kind: output, shape index: {}]  }
   0x1   :  { %11 = vsyncpa [#allocation6], 0 }
   0x2   :  { %12 = vsyncpa [#allocation9], 0  ;;  %s29_s20 = sshll.u32 %s728_s1, 4  ;;  %s30_s20 = int_to_ptr.hbm [resolvable:$true] %s29_s20 }
   0x3   :  { %13 = vsyncpa [#allocation4], 0  ;;  %s670_s21 = smov [#allocation5]   ;;  %s56_s25 = sshll.u32 %s730_s3, 4  ;;  %s57_s25 = int_to_ptr.hbm [resolvable:$true] %s56_s25 }
   0x4   :  { %s31_s22 = sshll.u32 %s670_s21, 4  ;;  %s671_s26 = smov 64   ;;  %s32_s22 = int_to_ptr.vmem [resolvable:$true] %s31_s22 }
   0x5   :  { %s672_s27 = smov 4   ;;  %s673_s28 = smov [#allocation8]  }
   0x6   :  { %37 = dma.hbm_to_vmem [thread:$0]  %s30_s20, 2048, %s32_s22, [#allocation6], %s671_s26, %s671_s26, %s672_s27  }
   0x7   :  { %s58_s29 = sshll.u32 %s673_s28, 4  ;;  %s19_s7 = sshll.u32 %s727_s0, 4  ;;  %s59_s29 = int_to_ptr.vmem [resolvable:$true] %s58_s29  ;;  %s20_s7 = int_to_ptr.hbm [resolvable:$true] %s19_s7 }
   0x8   :  { %61 = dma.hbm_to_vmem [thread:$0]  %s57_s25, 64, %s59_s29, [#allocation9]  }
   0x9   :  { %s42_s9 = sshll.u32 %s729_s2, 4  ;;  %s674_s10 = smov [#allocation2]   ;;  %s43_s9 = int_to_ptr.hbm [resolvable:$true] %s42_s9 }
   0xa   :  { %s21_s11 = sshll.u32 %s674_s10, 4  ;;  %s675_s3 = smov [#allocation7]   ;;  %s22_s11 = int_to_ptr.vmem [resolvable:$true] %s21_s11 }
   0xb   :  { %24 = dma.hbm_to_vmem [thread:$0]  %s20_s7, 256, %s22_s11, [#allocation3]  }
   0xc   :  { %s44_s12 = sshll.u32 %s675_s3, 4  ;;  %s67_s15 = sshll.u32 %s731_s4, 4  ;;  %s45_s12 = int_to_ptr.vmem [resolvable:$true] %s44_s12  ;;  %s68_s15 = int_to_ptr.hbm [resolvable:$true] %s67_s15 }
   0xd   :  { %50 = dma.hbm_to_vmem [thread:$0]  %s43_s9, 1024, %s45_s12, [#allocation6], %s671_s26, %s671_s26, %s672_s27  }
   0xe   :  { %s676_s0 = smov [#allocation10]  }
   0xf   :  { %s69_s16 = sshll.u32 %s676_s0, 4  ;;  %s70_s16 = int_to_ptr.vmem [resolvable:$true] %s69_s16 }
  0x10   :  { %72 = dma.hbm_to_vmem [thread:$0]  %s68_s15, 64, %s70_s16, [#allocation9]  }
  0x11   :  { %662 = dma.done.wait [#allocation3], 256  }
  0x12   :  { %663 = vsyncadd [#allocation3], 4294967040 }
  0x13   :  { %664 = dma.done.wait [#allocation6], 3072  }
  0x14   :  { %665 = vsyncadd [#allocation6], 4294964224 }
  0x15   :  { %666 = dma.done.wait [#allocation9], 128  }
  0x16   :  { %667 = vsyncadd [#allocation9], 4294967168  ;;  %v489_v0 = vld [vmem:[#allocation5 + $0x38] sm:$0xff]  ;;  %v488_v2 = vld [vmem:[#allocation5 + $0x30] sm:$0xff]  ;;  %v677_v39 = vmov 0   ;;  %s678_s2 = smov [#allocation11]  }
  0x17   :  { %v497_v1 = vld [vmem:[#allocation5 + $0x78] sm:$0xff]  ;;  %228 = vmatpush.bf16.msra.mxu0 %v489_v0  ;;  %v496_v3 = vld [vmem:[#allocation5 + $0x70] sm:$0xff]  ;;  %v487_v4 = vld [vmem:[#allocation5 + $0x28] sm:$0xff]  ;;  %515 = vset.pattern.permute.xlu0 %v677_v39  ;;  %s372_s4 = sshll.u32 %s678_s2, 4  ;;  %s374_s19 = sshll.u32 %s732_s5, 4  ;;  %vm365_vm3 = vcmask 57344   ;;  %s373_s4 = int_to_ptr.vmem [resolvable:$true] %s372_s4  ;;  %s375_s19 = int_to_ptr.hbm [resolvable:$true] %s374_s19 }
  0x18   :  { %241 = vmatpush.bf16.msra.mxu1 %v497_v1  ;;  %v495_v5 = vld [vmem:[#allocation5 + $0x68] sm:$0xff]  ;;  %v505_v6 = vld [vmem:[#allocation7 + $0x38] sm:$0xff]  ;;  %v504_v7 = vld [vmem:[#allocation7 + $0x30] sm:$0xff] }
  0x19   :  { %324 = vmatpush.bf16.msra.mxu2 %v505_v6  ;;  %v486_v8 = vld [vmem:[#allocation5 + $0x20] sm:$0xff]  ;;  %v503_v10 = vld [vmem:[#allocation7 + $0x28] sm:$0xff]  ;;  %v485_v11 = vld [vmem:[#allocation5 + $0x18] sm:$0xff] }
  0x1a   :  { %v494_v9 = vld [vmem:[#allocation5 + $0x60] sm:$0xff]  ;;  %v493_v12 = vld [vmem:[#allocation5 + $0x58] sm:$0xff]  ;;  %v484_v14 = vld [vmem:[#allocation5 + $0x10] sm:$0xff] }
  0x1b   :  { %229 = vmatpush.bf16.msra.mxu0 %v488_v2  ;;  %v502_v13 = vld [vmem:[#allocation7 + $0x20] sm:$0xff]  ;;  %v492_v15 = vld [vmem:[#allocation5 + $0x50] sm:$0xff]  ;;  %v501_v16 = vld [vmem:[#allocation7 + $0x18] sm:$0xff] }
  0x1c   :  { %242 = vmatpush.bf16.msra.mxu1 %v496_v3  ;;  %v483_v17 = vld [vmem:[#allocation5 + $0x8] sm:$0xff]  ;;  %v500_v19 = vld [vmem:[#allocation7 + $0x10] sm:$0xff]  ;;  %v482_v20 = vld [vmem:[#allocation5] sm:$0xff] }
  0x1d   :  { %325 = vmatpush.bf16.msra.mxu2 %v504_v7  ;;  %v491_v18 = vld [vmem:[#allocation5 + $0x48] sm:$0xff]  ;;  %v490_v21 = vld [vmem:[#allocation5 + $0x40] sm:$0xff]  ;;  %v94_v22 = vld [vmem:[#allocation2] sm:$0xff] }
  0x1e   :  { %v95_v23 = vld [vmem:[#allocation2 + $0x8] sm:$0xff]  ;;  %v96_v24 = vpack.c.bf16 %v94_v22, %v94_v22  ;;  %v499_v26 = vld [vmem:[#allocation7 + $0x8] sm:$0xff]  ;;  %v498_v27 = vld [vmem:[#allocation7] sm:$0xff] }
  0x1f   :  { %230 = vmatpush.bf16.msra.mxu0 %v487_v4  ;;  %v97_v25 = vpack.c.bf16 %v95_v23, %v95_v23  ;;  %v516_v28 = vld [vmem:[#allocation10] ss:$0 sm:$0xff]  ;;  %v355_v38 = vld [vmem:[#allocation10 + $0x2] sm:$0x1]  ;;  %v517_v40 = vld [vmem:[#allocation10 + $0x1] ss:$0 sm:$0xff] }
  0x20   :  { %243 = vmatpush.bf16.msra.mxu1 %v495_v5  ;;  %358 = vperm.xlu0 %515, %v355_v38   ;;  %v340_v47 = vld [vmem:[#allocation8] sm:$0xf] }
  0x21   :  { %326 = vmatpush.bf16.msra.mxu2 %v503_v10 }
  0x23   :  { %231 = vmatpush.bf16.msra.mxu0 %v486_v8 }
  0x24   :  { %244 = vmatpush.bf16.msra.mxu1 %v494_v9 }
  0x25   :  { %327 = vmatpush.bf16.msra.mxu2 %v502_v13 }
  0x27   :  { %232 = vmatpush.bf16.msra.mxu0 %v485_v11 }
  0x28   :  { %245 = vmatpush.bf16.msra.mxu1 %v493_v12 }
  0x29   :  { %328 = vmatpush.bf16.msra.mxu2 %v501_v16 }
  0x2b   :  { %233 = vmatpush.bf16.msra.mxu0 %v484_v14 }
  0x2c   :  { %246 = vmatpush.bf16.msra.mxu1 %v492_v15 }
  0x2d   :  { %329 = vmatpush.bf16.msra.mxu2 %v500_v19 }
  0x2f   :  { %234 = vmatpush.bf16.msra.mxu0 %v483_v17 }
  0x30   :  { %247 = vmatpush.bf16.msra.mxu1 %v491_v18 }
  0x31   :  { %330 = vmatpush.bf16.msra.mxu2 %v499_v26 }
  0x33   :  { %235 = vmatpush.bf16.msra.mxu0 %v482_v20 }
  0x34   :  { %248 = vmatpush.bf16.msra.mxu1 %v490_v21 }
  0x35   :  { %331 = vmatpush.bf16.msra.mxu2 %v498_v27 }
  0x36   :  { %236 = vmatmul.bf16.vlgmr.msra.gmra.mxu0 %v96_v24 }
  0x37   :  { %249 = vmatmul.bf16.vlgmr.msra.gmra.mxu1 %v97_v25 }
  0x92   :  { %v359_v48 = vpop.permute.xlu0 %358 }
  0xb3   :  { %v237_v29 = vpop.f32.mrf.mxu0 }
  0xb4   :  { %v250_v30 = vpop.f32.mrf.mxu1  ;;  %v238_v31 = vadd.f32 %v516_v28, %v237_v29 }
  0xb6   :  { %v251_v32 = vadd.f32 %v250_v30, %v238_v31 }
  0xb8   :  { %v255_v33 = vmul.f32 0.2, %v251_v32  ;;  %vm254_vm0 = vcmp.gt.f32.partialorder %v251_v32, 0.0 }
  0xba   :  { %v256_v34 = vsel %vm254_vm0, %v251_v32, %v255_v33 }
  0xbb   :  { %v239_v35 = vpop.f32.mrf.mxu0  ;;  %v257_v37 = vpack.c.bf16 %v256_v34, %v256_v34 }
  0xbc   :  { %v252_v36 = vpop.f32.mrf.mxu1 }
  0xbd   :  { %332 = vmatmul.bf16.vlgmr.msra.gmra.mxu2 %v257_v37 }
 0x140   :  { %v333_v41 = vpop.f32.mrf.mxu2 }
 0x141   :  { %v334_v42 = vadd.f32 %v517_v40, %v333_v41 }
 0x143   :  { %vm337_vm1 = vcmp.gt.f32.partialorder %v334_v42, 0.0  ;;  %v338_v43 = vmul.f32 0.2, %v334_v42 }
 0x145   :  { %v339_v44 = vsel %vm337_vm1, %v334_v42, %v338_v43 }
 0x146   :  { %v341_v45 = vpack.c.bf16 %v339_v44, %v339_v44 }
 0x148   :  { %v335_v46 = vpop.f32.mrf.mxu2  ;;  %349 = vmatpush.bf16.xpose.msra.mxu3 %v341_v45 }
 0x14f   :  { %350 = vmatmul.bf16.vlgmr.msra.gmra.mxu3 %v340_v47 }
 0x1d2   :  { %v351_v49 = vpop.f32.mrf.mxu3 }
 0x1d3   :  { %v361_v50 = vadd.f32 %v359_v48, %v351_v49 }
 0x1d5   :  { %vm362_vm2 = vcmp.gt.f32.partialorder %v361_v50, 0.0  ;;  %v363_v51 = vmul.f32 0.2, %v361_v50 }
 0x1d7   :  { %v364_v52 = vsel %vm362_vm2, %v361_v50, %v363_v51 }
 0x1d8   :  { %366 = vst.msk [vmem:[#allocation11] sm:$0x1] %vm365_vm3, %v364_v52 }
 0x1d9   :  { %377 = dma.vmem_to_hbm [thread:$0]  %s373_s4, 16, %s375_s19, [#allocation4]  }
 0x1da   :  { %v353_v53 = vpop.f32.mrf.mxu3 }
 0x1db   :  { %668 = dma.done.wait [#allocation4], 16  }
 0x1dc   :  { %669 = vsyncadd [#allocation4], 4294967280 }
 0x1dd   :  { %382 = vsyncpa [#allocation3], 1 }
 0x1de   :  { %383 = vsyncpa [#allocation6], 1 }
 0x1df   :  { %384 = vsyncpa [#allocation9], 1 }
 0x1e0   :  { %385 = vsyncpa [#allocation4], 1 }

</bundles_post_ra>
